<compile_context>
chip_gen: v5e
topology: v5e:2x2
jax: 0.10.0
libtpu: 0.0.40
codegen_flags: <defaults>
</compile_context>

<pallas_src>
import functools

import jax
import jax.numpy as jnp
from jax.experimental import pallas as pl
from jax.experimental.pallas import tpu as pltpu


def _round_up(x, m):
    return (x + m - 1) // m * m


def _vmem_capacity_bytes():
    cap = 64 * 1024 * 1024  # conservative default (v7x per-core VMEM)
    try:
        cap = int(pltpu.get_tpu_info().vmem_capacity_bytes)
    except Exception:
        pass
    return cap


def _pick_batch_tile(n, l_out_pad, *, c_in, c_in_pad, length, c_out, ksize,
                     itemsize, budget, target_lanes=2048):
    """Largest divisor of n (capped at n//2 so >=2 parallel grid steps survive
    for megacore sharding) whose per-step VMEM footprint fits `budget`; stop
    growing once the lane footprint nb*l_out_pad reaches `target_lanes`."""

    def footprint(nb):
        x_blk = 2 * nb * c_in * length * itemsize              # double-buffered in
        o_blk = 2 * c_out * nb * l_out_pad * itemsize          # double-buffered out
        w_blk = 2 * c_out * ksize * c_in_pad * itemsize
        scratch = ksize * c_in_pad * nb * l_out_pad * itemsize  # im2col RHS
        acc = c_out * nb * l_out_pad * 4                       # f32 matmul result
        return x_blk + o_blk + w_blk + scratch + acc

    max_nb = n if n < 2 else n // 2
    best = 1
    for cand in range(1, max_nb + 1):
        if n % cand:
            continue
        if footprint(cand) > budget:
            continue
        best = cand
        if cand * l_out_pad >= target_lanes:
            break
    return best


def _dilated_conv1d_kernel(x_ref, w_ref, b_ref, o_ref, stack_ref, *,
                           ksize, dilation, stride, pad, length,
                           l_out, l_out_pad, nb, c_in, c_in_pad):
    """Fused dilated conv for one batch-tile.

    x_ref:     (nb, C_in, L)               un-padded input slab (VMEM)
    w_ref:     (C_out, K*C_in_pad)         weight, taps folded into contraction dim
    b_ref:     (C_out, 1)                  bias
    o_ref:     (1, C_out, nb*L_out_pad)    lane-dense output slab
    stack_ref: (K*C_in_pad, nb*L_out_pad)  VMEM scratch: im2col RHS
    """
    dt = stack_ref.dtype
    total_w = nb * l_out_pad

    for k in range(ksize):
        s = k * dilation - pad                               # signed offset into x
        r0 = k * c_in_pad                                    # sublane-aligned row base
        j0 = 0 if s >= 0 else (-s + stride - 1) // stride    # first valid out col
        j0 = min(j0, l_out)
        j1 = 0 if (length - 1 - s) < 0 else (length - 1 - s) // stride + 1
        j1 = max(j0, min(j1, l_out))                         # one past last valid

        # Zero the sublane-pad rows of this tap (full width) every step so no
        # VMEM garbage (possibly NaN) can reach the accumulator, even when the
        # parallel grid axis is sharded across cores.
        if c_in_pad > c_in:
            stack_ref[r0 + c_in:r0 + c_in_pad, :] = jnp.zeros(
                (c_in_pad - c_in, total_w), dt)

        for b in range(nb):
            c0 = b * l_out_pad                               # 128-lane-aligned block start
            if j0 > 0:                                       # left zero halo
                stack_ref[r0:r0 + c_in, c0:c0 + j0] = jnp.zeros((c_in, j0), dt)
            if j1 > j0:                                      # valid data window
                src0 = s + j0 * stride
                if stride == 1:
                    stack_ref[r0:r0 + c_in, c0 + j0:c0 + j1] = (
                        x_ref[b, :, src0:src0 + (j1 - j0)])
                else:
                    # strided ref load keeps the decimation off the VPU/XLU path
                    stack_ref[r0:r0 + c_in, c0 + j0:c0 + j1] = (
                        x_ref[b, :, pl.ds(src0, j1 - j0, stride)])
            if j1 < l_out:                                   # right zero halo
                stack_ref[r0:r0 + c_in, c0 + j1:c0 + l_out] = jnp.zeros(
                    (c_in, l_out - j1), dt)
            # Columns [l_out, l_out_pad) are never consumed (the wrapper slices
            # them off), so they are deliberately left unwritten.

    # Single MXU matmul over the fused K*C_in_pad contraction dim, f32 accumulate,
    # then one lane-dense unmasked store of the whole result slab.
    acc = jnp.dot(w_ref[...], stack_ref[...], preferred_element_type=jnp.float32)
    acc = acc + b_ref[...]                                   # (C_out, 1) broadcast
    o_ref[0, :, :] = acc.astype(o_ref.dtype)


def dilated_conv1d(x, w, b, *, stride=1, dilation=1, groups=1):
    """Forward pass of DilatedConv (nn.Conv1d with padding=(kSize-1)//2*dilation)."""
    assert groups == 1, "TODO(synk): grouped conv (groups > 1) not implemented"
    n, c_in, length = x.shape
    c_out, c_in_w, ksize = w.shape
    assert c_in_w == c_in

    pad = (ksize - 1) // 2 * dilation
    l_out = (length + 2 * pad - dilation * (ksize - 1) - 1) // stride + 1

    itemsize = jnp.dtype(x.dtype).itemsize
    sublane = max(8, 32 // itemsize)             # 8 for f32, 16 for bf16, 32 for i8
    c_in_pad = _round_up(c_in, sublane)
    l_out_pad = _round_up(l_out, 128)

    vmem_cap = _vmem_capacity_bytes()
    nb = _pick_batch_tile(n, l_out_pad, c_in=c_in, c_in_pad=c_in_pad,
                          length=length, c_out=c_out, ksize=ksize,
                          itemsize=itemsize, budget=int(vmem_cap * 0.6))
    grid = (n // nb,)

    # (C_out, C_in, K) -> (C_out, K, C_in_pad) -> (C_out, K*C_in_pad): taps fold
    # into the contraction dim; zero rows pad C_in up to the sublane stride.
    w_t = jnp.transpose(w, (0, 2, 1))
    if c_in_pad != c_in:
        w_t = jnp.pad(w_t, ((0, 0), (0, 0), (0, c_in_pad - c_in)))
    w2 = w_t.reshape(c_out, ksize * c_in_pad)
    b2 = b.reshape(c_out, 1)

    kernel = functools.partial(
        _dilated_conv1d_kernel,
        ksize=ksize, dilation=dilation, stride=stride, pad=pad, length=length,
        l_out=l_out, l_out_pad=l_out_pad, nb=nb, c_in=c_in, c_in_pad=c_in_pad)

    flops = 2 * n * c_out * ksize * c_in_pad * l_out_pad
    bytes_accessed = int(n * c_in * length * itemsize           # x
                         + c_out * ksize * c_in_pad * itemsize  # w
                         + c_out * itemsize                     # b
                         + n * c_out * l_out_pad * itemsize)    # out

    out = pl.pallas_call(
        kernel,
        out_shape=jax.ShapeDtypeStruct((n // nb, c_out, nb * l_out_pad), x.dtype),
        grid=grid,
        in_specs=[
            # last two block dims equal the full array dims -> allowed sizes
            pl.BlockSpec((nb, c_in, length), lambda i: (i, 0, 0)),
            pl.BlockSpec((c_out, ksize * c_in_pad), lambda i: (0, 0)),
            pl.BlockSpec((c_out, 1), lambda i: (0, 0)),
        ],
        out_specs=pl.BlockSpec((1, c_out, nb * l_out_pad), lambda i: (i, 0, 0)),
        scratch_shapes=[pltpu.VMEM((ksize * c_in_pad, nb * l_out_pad), x.dtype)],
        compiler_params=pltpu.CompilerParams(
            dimension_semantics=("parallel",),
            vmem_limit_bytes=int(vmem_cap * 0.9)),
        cost_estimate=pl.CostEstimate(
            flops=flops, transcendentals=0, bytes_accessed=bytes_accessed),
    )(x, w2, b2)

    # Lane-dense kernel output -> (N, C_out, L_out): cheap layout plumbing.
    out = out.reshape(n // nb, c_out, nb, l_out_pad)
    out = jnp.transpose(out, (0, 2, 1, 3)).reshape(n, c_out, l_out_pad)
    return out[:, :, :l_out]


if __name__ == "__main__":
    def _reference(x, w, b, stride, d):
        ks = w.shape[-1]
        pad = (ks - 1) // 2 * d
        ref = jax.lax.conv_general_dilated(
            x, w, window_strides=(stride,), padding=[(pad, pad)],
            rhs_dilation=(d,), dimension_numbers=("NCH", "OIH", "NCH"))
        return ref + b[None, :, None]

    key = jax.random.PRNGKey(0)
    k1, k2, k3, k4, k5, k6 = jax.random.split(key, 6)

    # Test 1: the module's config — DilatedConv(nIn=4, nOut=8, kSize=3, stride=1, d=2).
    batch, nIn, nOut, kSize, stride, d, L = 2, 4, 8, 3, 1, 2, 16
    bound = 1.0 / (nIn * kSize) ** 0.5
    x = jax.random.normal(k1, (batch, nIn, L), dtype=jnp.float32)
    w = jax.random.uniform(k2, (nOut, nIn, kSize), jnp.float32, -bound, bound)
    b = jax.random.uniform(k3, (nOut,), jnp.float32, -bound, bound)
    out = jax.block_until_ready(dilated_conv1d(x, w, b, stride=stride, dilation=d))
    ref = _reference(x, w, b, stride, d)
    assert out.shape == ref.shape, (out.shape, ref.shape)
    assert jnp.allclose(out, ref, atol=1e-4, rtol=1e-4), \
        float(jnp.max(jnp.abs(out - ref)))

    # Test 2: odd channel counts / length to exercise sublane & lane padding and nb>1.
    batch, nIn, nOut, kSize, stride, d, L = 4, 5, 7, 5, 1, 3, 37
    bound = 1.0 / (nIn * kSize) ** 0.5
    x = jax.random.normal(k4, (batch, nIn, L), dtype=jnp.float32)
    w = jax.random.uniform(k5, (nOut, nIn, kSize), jnp.float32, -bound, bound)
    b = jax.random.uniform(k6, (nOut,), jnp.float32, -bound, bound)
    out = jax.block_until_ready(dilated_conv1d(x, w, b, stride=stride, dilation=d))
    ref = _reference(x, w, b, stride, d)
    assert out.shape == ref.shape, (out.shape, ref.shape)
    assert jnp.allclose(out, ref, atol=1e-4, rtol=1e-4), \
        float(jnp.max(jnp.abs(out - ref)))

    print("KERNEL_OK")
</pallas_src>

<mosaic_0001>
module attributes {stable_mosaic.version = 11 : i64} {
  func.func @_dilated_conv1d_kernel(%arg0: i32, %arg1: memref<1x4x16xf32, #tpu.memory_space<vmem>>, %arg2: memref<8x24xf32, #tpu.memory_space<vmem>>, %arg3: memref<8x1xf32, #tpu.memory_space<vmem>>, %arg4: memref<1x8x128xf32, #tpu.memory_space<vmem>>, %arg5: memref<24x128xf32, #tpu.memory_space<vmem>>) attributes {dimension_semantics = [#tpu.dimension_semantics<parallel>], iteration_bounds = array<i64: 2>, scalar_prefetch = 0 : i64, scratch_operands = 1 : i64, tpu.core_type = #tpu.core_type<tc>, window_params = [{transform_indices = @transform_0, window_bounds = array<i64: 1, 4, 16>}, {pipeline_mode = #tpu.pipeline_mode<synchronous>, transform_indices = @transform_1, window_bounds = array<i64: 8, 24>}, {pipeline_mode = #tpu.pipeline_mode<synchronous>, transform_indices = @transform_2, window_bounds = array<i64: 8, 1>}, {transform_indices = @transform_3, window_bounds = array<i64: 1, 8, 128>}]} {
    %cst = arith.constant 0.000000e+00 : f32
    %0 = vector.broadcast %cst : f32 to vector<4x128xf32>
    %c4 = arith.constant 4 : index
    %c0 = arith.constant 0 : index
    %1 = vector.load %arg5[%c4, %c0] : memref<24x128xf32, #tpu.memory_space<vmem>>, vector<4x128xf32>
    tpu.vector_store %arg5[%c4, %c0], %0 {strides = array<i32>} : memref<24x128xf32, #tpu.memory_space<vmem>>, vector<4x128xf32>,
    %cst_0 = arith.constant 0.000000e+00 : f32
    %2 = vector.broadcast %cst_0 : f32 to vector<4x2xf32>
    %c0_1 = arith.constant 0 : index
    %c0_2 = arith.constant 0 : index
    %3 = vector.load %arg5[%c0_1, %c0_2] : memref<24x128xf32, #tpu.memory_space<vmem>>, vector<4x2xf32>
    tpu.vector_store %arg5[%c0_1, %c0_2], %2 {strides = array<i32>} : memref<24x128xf32, #tpu.memory_space<vmem>>, vector<4x2xf32>,
    %c0_3 = arith.constant 0 : index
    %c0_4 = arith.constant 0 : index
    %c0_5 = arith.constant 0 : index
    %4 = vector.load %arg1[%c0_3, %c0_4, %c0_5] : memref<1x4x16xf32, #tpu.memory_space<vmem>>, vector<1x4x14xf32>
    %5 = vector.shape_cast %4 : vector<1x4x14xf32> to vector<4x14xf32>
    %c0_6 = arith.constant 0 : index
    %c2 = arith.constant 2 : index
    %6 = vector.load %arg5[%c0_6, %c2] : memref<24x128xf32, #tpu.memory_space<vmem>>, vector<4x14xf32>
    tpu.vector_store %arg5[%c0_6, %c2], %5 {strides = array<i32>} : memref<24x128xf32, #tpu.memory_space<vmem>>, vector<4x14xf32>,
    %cst_7 = arith.constant 0.000000e+00 : f32
    %7 = vector.broadcast %cst_7 : f32 to vector<4x128xf32>
    %c12 = arith.constant 12 : index
    %c0_8 = arith.constant 0 : index
    %8 = vector.load %arg5[%c12, %c0_8] : memref<24x128xf32, #tpu.memory_space<vmem>>, vector<4x128xf32>
    tpu.vector_store %arg5[%c12, %c0_8], %7 {strides = array<i32>} : memref<24x128xf32, #tpu.memory_space<vmem>>, vector<4x128xf32>,
    %c0_9 = arith.constant 0 : index
    %c0_10 = arith.constant 0 : index
    %c0_11 = arith.constant 0 : index
    %9 = vector.load %arg1[%c0_9, %c0_10, %c0_11] : memref<1x4x16xf32, #tpu.memory_space<vmem>>, vector<1x4x16xf32>
    %10 = vector.shape_cast %9 : vector<1x4x16xf32> to vector<4x16xf32>
    %c8 = arith.constant 8 : index
    %c0_12 = arith.constant 0 : index
    %11 = vector.load %arg5[%c8, %c0_12] : memref<24x128xf32, #tpu.memory_space<vmem>>, vector<4x16xf32>
    tpu.vector_store %arg5[%c8, %c0_12], %10 {strides = array<i32>} : memref<24x128xf32, #tpu.memory_space<vmem>>, vector<4x16xf32>,
    %cst_13 = arith.constant 0.000000e+00 : f32
    %12 = vector.broadcast %cst_13 : f32 to vector<4x128xf32>
    %c20 = arith.constant 20 : index
    %c0_14 = arith.constant 0 : index
    %13 = vector.load %arg5[%c20, %c0_14] : memref<24x128xf32, #tpu.memory_space<vmem>>, vector<4x128xf32>
    tpu.vector_store %arg5[%c20, %c0_14], %12 {strides = array<i32>} : memref<24x128xf32, #tpu.memory_space<vmem>>, vector<4x128xf32>,
    %c0_15 = arith.constant 0 : index
    %c0_16 = arith.constant 0 : index
    %c2_17 = arith.constant 2 : index
    %14 = vector.load %arg1[%c0_15, %c0_16, %c2_17] : memref<1x4x16xf32, #tpu.memory_space<vmem>>, vector<1x4x14xf32>
    %15 = vector.shape_cast %14 : vector<1x4x14xf32> to vector<4x14xf32>
    %c16 = arith.constant 16 : index
    %c0_18 = arith.constant 0 : index
    %16 = vector.load %arg5[%c16, %c0_18] : memref<24x128xf32, #tpu.memory_space<vmem>>, vector<4x14xf32>
    tpu.vector_store %arg5[%c16, %c0_18], %15 {strides = array<i32>} : memref<24x128xf32, #tpu.memory_space<vmem>>, vector<4x14xf32>,
    %cst_19 = arith.constant 0.000000e+00 : f32
    %17 = vector.broadcast %cst_19 : f32 to vector<4x2xf32>
    %c16_20 = arith.constant 16 : index
    %c14 = arith.constant 14 : index
    %18 = vector.load %arg5[%c16_20, %c14] : memref<24x128xf32, #tpu.memory_space<vmem>>, vector<4x2xf32>
    tpu.vector_store %arg5[%c16_20, %c14], %17 {strides = array<i32>} : memref<24x128xf32, #tpu.memory_space<vmem>>, vector<4x2xf32>,
    %c0_21 = arith.constant 0 : index
    %c0_22 = arith.constant 0 : index
    %19 = vector.load %arg2[%c0_21, %c0_22] : memref<8x24xf32, #tpu.memory_space<vmem>>, vector<8x24xf32>
    %c0_23 = arith.constant 0 : index
    %c0_24 = arith.constant 0 : index
    %20 = vector.load %arg5[%c0_23, %c0_24] : memref<24x128xf32, #tpu.memory_space<vmem>>, vector<24x128xf32>
    %cst_25 = arith.constant dense<0.000000e+00> : vector<8x128xf32>
    %21 = tpu.matmul %19, %20, %cst_25 {dimension_numbers = #tpu.dot_dimension_numbers<[1], [0], [0], [1], [0, 0, 1, 1], [], []>} : vector<8x24xf32>, vector<24x128xf32>, vector<8x128xf32> -> vector<8x128xf32>
    %c0_26 = arith.constant 0 : index
    %c0_27 = arith.constant 0 : index
    %22 = vector.load %arg3[%c0_26, %c0_27] : memref<8x1xf32, #tpu.memory_space<vmem>>, vector<8x1xf32>
    %23 = vector.broadcast %22 : vector<8x1xf32> to vector<8x128xf32>
    %24 = arith.addf %21, %23 : vector<8x128xf32>
    %c0_28 = arith.constant 0 : index
    %c0_29 = arith.constant 0 : index
    %c0_30 = arith.constant 0 : index
    %25 = vector.load %arg4[%c0_28, %c0_29, %c0_30] : memref<1x8x128xf32, #tpu.memory_space<vmem>>, vector<1x8x128xf32>
    %26 = vector.shape_cast %25 : vector<1x8x128xf32> to vector<8x128xf32>
    %27 = vector.shape_cast %24 : vector<8x128xf32> to vector<1x8x128xf32>
    tpu.vector_store %arg4[%c0_28, %c0_29, %c0_30], %27 {strides = array<i32>} : memref<1x8x128xf32, #tpu.memory_space<vmem>>, vector<1x8x128xf32>,
    return
  }
  func.func @transform_0(%arg0: i32) -> (i32, i32, i32) {
    %c0_i32 = arith.constant 0 : i32
    %c0_i32_0 = arith.constant 0 : i32
    %c0_i32_1 = arith.constant 0 : i32
    return %arg0, %c0_i32, %c0_i32_0 : i32, i32, i32
  }
  func.func @transform_1(%arg0: i32) -> (i32, i32) {
    %c0_i32 = arith.constant 0 : i32
    %c0_i32_0 = arith.constant 0 : i32
    %c0_i32_1 = arith.constant 0 : i32
    return %c0_i32, %c0_i32_0 : i32, i32
  }
  func.func @transform_2(%arg0: i32) -> (i32, i32) {
    %c0_i32 = arith.constant 0 : i32
    %c0_i32_0 = arith.constant 0 : i32
    %c0_i32_1 = arith.constant 0 : i32
    return %c0_i32, %c0_i32_0 : i32, i32
  }
  func.func @transform_3(%arg0: i32) -> (i32, i32, i32) {
    %c0_i32 = arith.constant 0 : i32
    %c0_i32_0 = arith.constant 0 : i32
    %c0_i32_1 = arith.constant 0 : i32
    return %arg0, %c0_i32, %c0_i32_0 : i32, i32, i32
  }
}

</mosaic_0001>

<bundles_post_ra>
// kernel: tpu_custom_call.1
= control target key start
LH: loop header
LB: loop body
LE: loop exit
PB: predicated region body
PF: predicated region fallthrough
CT: control target
= control target key end

     0   :  { %8 = vsyncpa [#allocation4], 0  ;;  %s611_s0 = inlined_call_operand.vmem [shape: f32[2,4,16], index: 0, kind: input, shape index: {}]   ;;  %s612_s1 = inlined_call_operand.hbm [shape: f32[8,24], index: 1, kind: input, shape index: {}]   ;;  %s613_s2 = inlined_call_operand.vmem [shape: f32[8,1], index: 2, kind: input, shape index: {}]   ;;  %s614_s3 = inlined_call_operand.hbm [shape: f32[2,8,128], index: 3, kind: output, shape index: {}]  }
   0x1   :  { %9 = vsyncpa [#allocation5], 0 }
   0x2   :  { %11 = vsyncpa [#allocation5 + $0x1], 0  ;;  %s519_s12 = smov 0   ;;  %s521_s13 = smov 0  }
   0x3   :  { %s523_s14 = smov 0   ;;  %s525_s15 = smov 0  }
   0x4 LB: > { %s540_s16 = sadd.s32 4294967295, %s492_s15   ;;  %s327_s17 = sadd.s32 4294967294, %s492_s15   ;;  %s492_s15 = sphi %s525_s15, %s620_s15   ;;  %s488_s14 = sphi %s523_s14, %s619_s14   ;;  %s484_s13 = sphi %s521_s13, %s618_s13   ;;  %s480_s12 = sphi %s519_s12, %s617_s12  }
   0x5   : > { %s544_s18 = sadd.s32 1, %s492_s15   ;;  %s92_s19 = sadd.s32 1, %s488_s14 }
   0x6   : > { %s89_s20 = ssub.s32 %s492_s15, %s544_s18  ;;  %p102_p0 = scmp.ne.s32.totalorder %s488_s14, %s484_s13 }
   0x7   : > { %p90_p1 = scmp.eq.s32.totalorder %s89_s20, 0  ;;  %p103_p2 = scmp.eq.s32.totalorder %s540_s16, 1 }
   0x8   : > { %p108_p3 = scmp.ne.s32.totalorder %s484_s13, %s480_s12  ;;  %p109_p4 = scmp.eq.s32.totalorder %s327_s17, 1 }
   0x9   : > { %s555_s21 = scalar_select %p90_p1, %s488_s14, %s92_s19  }
   0xa   : > { %p557_p5 = por %p103_p2, %p102_p0  ;;  %p561_p6 = por %p109_p4, %p108_p3 }
   0xb   : > { %p328_p7 = scmp.ge.s32.totalorder %s492_s15, 1  ;;  %p116_p8 = scmp.lt.s32.totalorder %s492_s15, 3 }
   0xc   : > { %p354_p9 = scmp.eq.s32.totalorder %s540_s16, 0  ;;  %s128_s26 = sshll.u32 %s612_s1, 4  ;;  %s129_s26 = int_to_ptr.hbm [resolvable:$true] %s128_s26 }
   0xd   : > { %p117_p10 = pnand %p328_p7, %p116_p8  ;;  %s494_s27 = smov [#allocation3]  }
   0xe   : > { %s130_s28 = sshll.u32 %s494_s27, 4  ;;  %s131_s28 = int_to_ptr.vmem [resolvable:$true] %s130_s28 }
   0xf   : > { %p346_p11 = pneg %p117_p10  ;;  %153 = sbr.rel (%p117_p10) target bundleno = 291 (0x123), region = 32 }
  0x11   : > { %p347_p12 = pnand %p354_p9, %p346_p11 }
  0x13   : > { %349 = dma.hbm_to_vmem [thread:$0]  (!%p347_p12), %s129_s26, 128, %s131_s28, [#allocation4]  }
  0x14   : > { %471 = dma.done.wait (%p354_p9), [#allocation4], 128  }
  0x15   : > { %473 = vsyncadd (%p354_p9), [#allocation4], 4294967168  ;;  %p177_p13 = scmp.lt.s32.totalorder %s540_s16, 1  ;;  %v495_v0 = vmov 0.0   ;;  %vm193_vm0 = vcmask 125952   ;;  %s496_s7 = smov 126  }
  0x16   : > { %181 = vst [vmem:[#allocation2 + $0x4] sm:$0xf] %v495_v0  ;;  %s497_s8 = smov 2   ;;  %vm182_vm1 = vcmask 11264   ;;  %v209_v4 = vld [vmem:[%s613_s2] sm:$0xff]  ;;  %v498_v5 = vmov 0  }
  0x17   : > { %s178_s29 = scalar_select %p177_p13, %s540_s16, 1  ;;  %191 = vst [vmem:[#allocation2 + $0xc] sm:$0xf] %v495_v0  ;;  %394 = vset.pattern.permute.xlu1 %v498_v5  ;;  %395 = vset.pattern.permute.xlu0 %v498_v5  ;;  %vm201_vm2 = vcmask 109568   ;;  %vm203_vm3 = vcmask 126064   ;;  %vm189_vm4 = vcmask 125968  }
  0x18   : > { %195 = vst [vmem:[#allocation2 + $0x14] sm:$0xf] %v495_v0  ;;  %212 = vperm.xlu1 %394, %v209_v4   ;;  %v205_v10 = vld [vmem:[#allocation3] sm:$0xff]  ;;  %vm215_vm5 = vcmask 195584   ;;  %s174_s11 = sand.u32 1, %s484_s13   ;;  %s337_s19 = sshll.u32 %s540_s16, 3 }
  0x19   : > { %s334_s30 = sshll.u32 %s178_s29, 2  ;;  %183 = vst.msk [vmem:[#allocation2] sm:$0xf] %vm182_vm1, %v495_v0  ;;  %s333_s17 = sshll.u32 %s174_s11, 3 }
  0x1a   : > { %s180_s6 = scalar_lea.vmem %s611_s0, %s334_s30  ;;  %s251_s25 = scalar_lea.hbm %s614_s3, %s337_s19 }
  0x1b   : > { %v196_v1 = vld [vmem:[%s180_s6] sm:$0xf]  ;;  %s176_s26 = scalar_lea.vmem [#allocation6], %s333_s17  ;;  %s255_s28 = sshll.u32 %s251_s25, 4  ;;  %s256_s28 = int_to_ptr.hbm [resolvable:$true] %s255_s28 }
  0x1c   : > { %v192_v2 = vld [vmem:[%s180_s6] sm:$0xf]  ;;  %198 = vrot.lane.b32.xlu0 %v196_v1, %s496_s7  ;;  %s253_s27 = sshll.u32 %s176_s26, 4  ;;  %s241_s29 = scalar_lea.sflag [#allocation5], %s174_s11  ;;  %s254_s27 = int_to_ptr.vmem [resolvable:$true] %s253_s27 }
  0x1d   : > { %194 = vst.msk [vmem:[#allocation2 + $0x8] sm:$0xf] %vm193_vm0, %v192_v2  ;;  %v184_v3 = vld [vmem:[%s180_s6] sm:$0xf]  ;;  %s440_s30 = sshra.s32 %s256_s28, 4  ;;  %s446_s6 = scalar_lea.hbm %s614_s3, 16  ;;  %s441_s30 = int_to_ptr.hbm [resolvable:$true] %s440_s30 }
  0x1e   : > { %s442_s4 = scalar_lea.hbm %s441_s30, 8  ;;  %p447_p3 = scmp.lt.s32.totalorder %s441_s30, %s614_s3 }
  0x1f   : > { %p443_p0 = scmp.ne.s32.totalorder %s441_s30, %s442_s4  ;;  %p448_p4 = scmp.lt.s32.totalorder %s446_s6, %s442_s4 }
  0x21   : > { %p444_p1 = pnand %p443_p0, %p557_p5  ;;  %p449_p7 = por %p448_p4, %p447_p3 }
  0x23   : > { %p445_p2 = pneg %p444_p1 }
  0x24   : > { %186 = vrot.lane.b32.xlu0 %v184_v3, %s497_s8  ;;  %v207_v9 = vld [vmem:[#allocation2 + $0x8] sm:$0xff] }
  0x25   : > { %p450_p8 = pnand %p449_p7, %p445_p2 }
  0x8a   : > { %v213_v12 = vpop.permute.xlu1 %212 }
  0x8e   : > { %v199_v6 = vpop.permute.xlu0 %198 }
  0x8f   : > { %202 = vst.msk [vmem:[#allocation2 + $0x10] sm:$0xf] %vm201_vm2, %v199_v6 }
  0x90   : > { %204 = vst.msk [vmem:[#allocation2 + $0x10] sm:$0xf] %vm203_vm3, %v495_v0 }
  0x96   : > { %v187_v7 = vpop.permute.xlu0 %186 }
  0x97   : > { %190 = vst.msk [vmem:[#allocation2] sm:$0xf] %vm189_vm4, %v187_v7  ;;  %v208_v8 = vld [vmem:[#allocation2 + $0x10] sm:$0xff] }
  0x98   : > { %232 = vmatpush.msra.mxu0 %v208_v8 }
  0x9a   : > { %233 = vmatpush.msra.mxu0 %v207_v9 }
  0x9e   : > { %v206_v11 = vld [vmem:[#allocation2] sm:$0xff] }
  0x9f   : > { %234 = vmatpush.msra.mxu0 %v206_v11 }
  0xa0   : > { %335 = vmatmul.msk.f32.vlgmr.msra.gmra.mxu0 %vm215_vm5, %v205_v10 }
 0x11d   : > { %v236_v13 = vpop.f32.mrf.mxu0 }
 0x11e   : > { %v237_v14 = vadd.f32 %v236_v13, %v213_v12 }
 0x120   : > { %239 = vst [vmem:[%s176_s26] sm:$0xff] %v237_v14 }
 0x121   : > { %453 = shalt.err (!%p450_p8)
}
 0x122   : > { %344 = dma.vmem_to_hbm [thread:$0]  (%p557_p5), %s254_s27, 128, %s256_s28, %s241_s29  }
 0x123 PF: > { %p356_p9 = scmp.ge.s32.totalorder %s492_s15, 2  ;;  %s267_s9 = sand.u32 1, %s480_s12  }
 0x124   : > { %s268_s10 = scalar_lea.sflag [#allocation5], %s267_s9 }
 0x125   : > { %p351_p10 = pnand %p356_p9, %p561_p6 }
 0x127   : > { %p352_p11 = pneg %p351_p10 }
 0x129   : > { %475 = dma.done.wait (%p352_p11), %s268_s10, 128  }
 0x12a   : > { %477 = vsyncadd (%p352_p11), %s268_s10, 4294967168  ;;  %p14_p12 = scmp.ge.s32.totalorder %s544_s18, 4   ;;  %s617_s12 = smov %s484_s13 }
 0x12b   : > { %s618_s13 = smov %s488_s14  ;;  %s619_s14 = smov %s555_s21 }
 0x12c   : > { %s620_s15 = smov %s544_s18  ;;  %16 = sbr.rel (!%p14_p12) target bundleno = 4 (0x4), region = 72 }
 0x131   :  { %274 = vsyncpa [#allocation4], 1 }
 0x132   :  { %276 = vsyncpa [#allocation4 + $0x1], 1 }
 0x133   :  { %277 = vsyncpa [#allocation5], 1 }
 0x134   :  { %279 = vsyncpa [#allocation5 + $0x1], 1 }

</bundles_post_ra>
